<compile_context>
chip_gen: v6e
topology: v6e:2x2x1
jax: 0.10.0
libtpu: 0.0.40
codegen_flags: <defaults>
</compile_context>

<pallas_src>
import functools

import jax
import jax.numpy as jnp
from jax.experimental import pallas as pl
from jax.experimental.pallas import tpu as pltpu

INPUT_SIZE = 16
HIDDEN_SIZE = 256
OUTPUT_SIZE = 4
LN_EPS = 1e-5


def _layernorm(h, gamma, beta):
    # Single-pass statistics: mean and E[h^2] in one sweep over the slab.
    mu = jnp.mean(h, axis=-1, keepdims=True)
    ms = jnp.mean(h * h, axis=-1, keepdims=True)
    var = ms - mu * mu
    return (h - mu) * jax.lax.rsqrt(var + LN_EPS) * gamma + beta


def dqn_kernel(x_ref,
               w1_ref, b1_ref, g1_ref, be1_ref,
               w2_ref, b2_ref, g2_ref, be2_ref,
               w3_ref, b3_ref,
               w4_ref, b4_ref,
               o_ref):
    # bf16 MXU operands, f32 accumulation; elementwise/LayerNorm math in f32.
    x = x_ref[...].astype(jnp.bfloat16)

    # Linear(16, 256) + ReLU + LayerNorm(256)
    h1 = jnp.dot(x, w1_ref[...], preferred_element_type=jnp.float32) + b1_ref[...]
    h1 = jnp.maximum(h1, 0.0)
    h1 = _layernorm(h1, g1_ref[...], be1_ref[...])

    # Linear(256, 256) + ReLU + LayerNorm(256)
    h2 = jnp.dot(h1.astype(jnp.bfloat16), w2_ref[...],
                 preferred_element_type=jnp.float32) + b2_ref[...]
    h2 = jnp.maximum(h2, 0.0)
    h2 = _layernorm(h2, g2_ref[...], be2_ref[...])

    # Linear(256, 128) + ReLU
    h3 = jnp.dot(h2.astype(jnp.bfloat16), w3_ref[...],
                 preferred_element_type=jnp.float32) + b3_ref[...]
    h3 = jnp.maximum(h3, 0.0)

    # Linear(128, 4) -- true-width output, stored directly (no padding).
    out = jnp.dot(h3.astype(jnp.bfloat16), w4_ref[...],
                  preferred_element_type=jnp.float32) + b4_ref[...]
    o_ref[...] = out.astype(o_ref.dtype)


def _round_up(n, m):
    return ((n + m - 1) // m) * m


def _detect_num_tensorcores():
    """Best-effort: 2 TensorCores per chip on v7x, 1 on v5e/v6e."""
    try:
        kind = jax.devices()[0].device_kind.lower()
    except Exception:
        return 1
    return 2 if "v7" in kind else 1


def _pick_tile(batch, bt, num_cores):
    """Effective batch tile (multiple of 8, or == batch for tiny batches)."""
    if batch > bt:
        return bt
    # The whole batch fits in one tile.
    if num_cores > 1 and batch >= 64:
        # Multi-TensorCore chip (v7x): split so the "parallel" batch axis can
        # shard grid steps across cores; both halves are multiples of 8.
        return _round_up(pl.cdiv(batch, num_cores), 8)
    # Single TensorCore (v5e/v6e): one tile, full-M matmuls, no extra step.
    return batch


@functools.partial(jax.jit,
                   static_argnames=("bt", "num_cores", "vmem_limit_bytes"))
def dqn_forward(x, prepared_params, *, bt=1024, num_cores=1,
                vmem_limit_bytes=None):
    """x: (B, INPUT_SIZE) float32 -> (B, OUTPUT_SIZE) float32.

    `prepared_params` must come from prepare_params() (bf16 weights), built
    once outside this jitted call.  `bt` is the batch-tile knob: 1024-2048 on
    v6e/v7x; on v5e keep bt<=~1024 or pass vmem_limit_bytes (scoped default is
    16 MiB); on v7x physical VMEM is 64 MiB so cap sweeps around ~4096.
    """
    B = x.shape[0]
    bt_eff = _pick_tile(B, bt, num_cores)
    grid = (pl.cdiv(B, bt_eff),)   # ragged last block handled by Pallas masking

    (w1, b1, g1, be1, w2, b2, g2, be2, w3, b3, w4, b4) = prepared_params

    act_in_spec = pl.BlockSpec((bt_eff, INPUT_SIZE), lambda i: (i, 0))
    out_spec = pl.BlockSpec((bt_eff, OUTPUT_SIZE), lambda i: (i, 0))

    # Parameters use constant index_maps so they are DMA'd once and stay
    # resident across all grid steps (whole set is <0.3 MiB in bf16).
    def rep(arr):
        return pl.BlockSpec(arr.shape, lambda i: (0, 0))

    H, H2 = HIDDEN_SIZE, HIDDEN_SIZE // 2
    mm_elems = INPUT_SIZE * H + H * H + H * H2 + H2 * OUTPUT_SIZE
    cost = pl.CostEstimate(
        flops=2 * B * mm_elems,
        transcendentals=2 * B,   # two rsqrt's per row (the LayerNorms)
        bytes_accessed=B * 4 * (INPUT_SIZE + OUTPUT_SIZE) + 2 * mm_elems,
    )

    out = pl.pallas_call(
        dqn_kernel,
        out_shape=jax.ShapeDtypeStruct((B, OUTPUT_SIZE), jnp.float32),
        grid_spec=pltpu.PrefetchScalarGridSpec(
            num_scalar_prefetch=0,
            grid=grid,
            in_specs=[
                act_in_spec,
                rep(w1), rep(b1), rep(g1), rep(be1),
                rep(w2), rep(b2), rep(g2), rep(be2),
                rep(w3), rep(b3),
                rep(w4), rep(b4),
            ],
            out_specs=out_spec,
        ),
        compiler_params=pltpu.CompilerParams(
            dimension_semantics=("parallel",),
            vmem_limit_bytes=vmem_limit_bytes,
        ),
        cost_estimate=cost,
    )(x, w1, b1, g1, be1, w2, b2, g2, be2, w3, b3, w4, b4)

    return out


def prepare_params(params):
    """One-time conversion of f32 params to kernel form (bf16 matmul weights).

    Call once, outside the jitted forward, and reuse the result across calls —
    this keeps per-call XLA convert/pad kernels out of the inference path.
    """
    (w1, b1, g1, be1, w2, b2, g2, be2, w3, b3, w4, b4) = params
    bf = jnp.bfloat16
    return (w1.astype(bf), b1, g1, be1,
            w2.astype(bf), b2, g2, be2,
            w3.astype(bf), b3,
            w4.astype(bf), b4)


def init_params(key):
    """Deterministic synthetic parameters matching the PyTorch module shapes.

    Weights stored as (in, out) — the transpose of nn.Linear storage — and
    biases / LayerNorm params stored as (1, out) so they are 2-D
    (VMEM-friendly) and broadcast over the batch inside the kernel.
    """
    ks = jax.random.split(key, 8)
    H, H2 = HIDDEN_SIZE, HIDDEN_SIZE // 2

    def lin(kw, kb, fan_in, fan_out):
        bound = 1.0 / jnp.sqrt(fan_in)
        w = jax.random.uniform(kw, (fan_in, fan_out), jnp.float32, -bound, bound)
        b = jax.random.uniform(kb, (1, fan_out), jnp.float32, -bound, bound)
        return w, b

    w1, b1 = lin(ks[0], ks[1], INPUT_SIZE, H)
    w2, b2 = lin(ks[2], ks[3], H, H)
    w3, b3 = lin(ks[4], ks[5], H, H2)
    w4, b4 = lin(ks[6], ks[7], H2, OUTPUT_SIZE)

    g1 = jnp.ones((1, H), jnp.float32)
    be1 = jnp.zeros((1, H), jnp.float32)
    g2 = jnp.ones((1, H), jnp.float32)
    be2 = jnp.zeros((1, H), jnp.float32)

    return (w1, b1, g1, be1, w2, b2, g2, be2, w3, b3, w4, b4)


def dqn_forward_ref(x, params):
    """Pure-f32 reference (original nn.Module semantics)."""
    (w1, b1, g1, be1, w2, b2, g2, be2, w3, b3, w4, b4) = params
    h = jnp.maximum(x @ w1 + b1, 0.0)
    h = _layernorm(h, g1, be1)
    h = jnp.maximum(h @ w2 + b2, 0.0)
    h = _layernorm(h, g2, be2)
    h = jnp.maximum(h @ w3 + b3, 0.0)
    return h @ w4 + b4


def dqn_forward_mixed_ref(x, params):
    """bf16-operand / f32-accumulate reference mirroring the kernel precision."""
    (w1, b1, g1, be1, w2, b2, g2, be2, w3, b3, w4, b4) = params

    def mm(a, w):
        return jnp.dot(a.astype(jnp.bfloat16), w.astype(jnp.bfloat16),
                       preferred_element_type=jnp.float32)

    h = jnp.maximum(mm(x, w1) + b1, 0.0)
    h = _layernorm(h, g1, be1)
    h = jnp.maximum(mm(h, w2) + b2, 0.0)
    h = _layernorm(h, g2, be2)
    h = jnp.maximum(mm(h, w3) + b3, 0.0)
    return mm(h, w4) + b4


if __name__ == "__main__":
    key = jax.random.PRNGKey(0)
    kp, kx1, kx2 = jax.random.split(key, 3)
    params = init_params(kp)
    prepared = prepare_params(params)          # bf16 weight prep, done once
    num_cores = _detect_num_tensorcores()      # 2 on v7x, 1 on v5e/v6e

    # Small batch (single full-array block) and a larger / ragged batch.
    for batch, kx in ((2, kx1), (300, kx2)):
        x = jax.random.normal(kx, (batch, INPUT_SIZE), jnp.float32)
        out = dqn_forward(x, prepared, num_cores=num_cores)
        jax.block_until_ready(out)
        assert out.shape == (batch, OUTPUT_SIZE)

        # Tight check against a reference with matching mixed precision.
        ref_mixed = dqn_forward_mixed_ref(x, params)
        assert jnp.allclose(out, ref_mixed, atol=1e-2, rtol=1e-2)

        # Loose check against the original full-f32 module semantics.
        ref_f32 = dqn_forward_ref(x, params)
        assert jnp.allclose(out, ref_f32, atol=1e-1, rtol=1e-1)

    print("KERNEL_OK")
</pallas_src>

<mosaic_0001>
module attributes {stable_mosaic.version = 11 : i64} {
  func.func @dqn_kernel(%arg0: i32, %arg1: memref<2x16xf32, #tpu.memory_space<vmem>>, %arg2: memref<16x256xbf16, #tpu.memory_space<vmem>>, %arg3: memref<1x256xf32, #tpu.memory_space<vmem>>, %arg4: memref<1x256xf32, #tpu.memory_space<vmem>>, %arg5: memref<1x256xf32, #tpu.memory_space<vmem>>, %arg6: memref<256x256xbf16, #tpu.memory_space<vmem>>, %arg7: memref<1x256xf32, #tpu.memory_space<vmem>>, %arg8: memref<1x256xf32, #tpu.memory_space<vmem>>, %arg9: memref<1x256xf32, #tpu.memory_space<vmem>>, %arg10: memref<256x128xbf16, #tpu.memory_space<vmem>>, %arg11: memref<1x128xf32, #tpu.memory_space<vmem>>, %arg12: memref<128x4xbf16, #tpu.memory_space<vmem>>, %arg13: memref<1x4xf32, #tpu.memory_space<vmem>>, %arg14: memref<2x4xf32, #tpu.memory_space<vmem>>) attributes {dimension_semantics = [#tpu.dimension_semantics<parallel>], iteration_bounds = array<i64: 1>, scalar_prefetch = 0 : i64, scratch_operands = 0 : i64, tpu.core_type = #tpu.core_type<tc>, window_params = [{transform_indices = @transform_0, window_bounds = array<i64: 2, 16>}, {pipeline_mode = #tpu.pipeline_mode<synchronous>, transform_indices = @transform_1, window_bounds = array<i64: 16, 256>}, {pipeline_mode = #tpu.pipeline_mode<synchronous>, transform_indices = @transform_2, window_bounds = array<i64: 1, 256>}, {pipeline_mode = #tpu.pipeline_mode<synchronous>, transform_indices = @transform_3, window_bounds = array<i64: 1, 256>}, {pipeline_mode = #tpu.pipeline_mode<synchronous>, transform_indices = @transform_4, window_bounds = array<i64: 1, 256>}, {pipeline_mode = #tpu.pipeline_mode<synchronous>, transform_indices = @transform_5, window_bounds = array<i64: 256, 256>}, {pipeline_mode = #tpu.pipeline_mode<synchronous>, transform_indices = @transform_6, window_bounds = array<i64: 1, 256>}, {pipeline_mode = #tpu.pipeline_mode<synchronous>, transform_indices = @transform_7, window_bounds = array<i64: 1, 256>}, {pipeline_mode = #tpu.pipeline_mode<synchronous>, transform_indices = @transform_8, window_bounds = array<i64: 1, 256>}, {pipeline_mode = #tpu.pipeline_mode<synchronous>, transform_indices = @transform_9, window_bounds = array<i64: 256, 128>}, {pipeline_mode = #tpu.pipeline_mode<synchronous>, transform_indices = @transform_10, window_bounds = array<i64: 1, 128>}, {pipeline_mode = #tpu.pipeline_mode<synchronous>, transform_indices = @transform_11, window_bounds = array<i64: 128, 4>}, {pipeline_mode = #tpu.pipeline_mode<synchronous>, transform_indices = @transform_12, window_bounds = array<i64: 1, 4>}, {transform_indices = @transform_13, window_bounds = array<i64: 2, 4>}]} {
    %c0 = arith.constant 0 : index
    %c0_0 = arith.constant 0 : index
    %0 = vector.load %arg1[%c0, %c0_0] : memref<2x16xf32, #tpu.memory_space<vmem>>, vector<2x16xf32>
    %1 = arith.truncf %0 : vector<2x16xf32> to vector<2x16xbf16>
    %c0_1 = arith.constant 0 : index
    %c0_2 = arith.constant 0 : index
    %2 = vector.load %arg2[%c0_1, %c0_2] : memref<16x256xbf16, #tpu.memory_space<vmem>>, vector<16x256xbf16>
    %cst = arith.constant dense<0.000000e+00> : vector<2x256xf32>
    %3 = tpu.matmul %1, %2, %cst {dimension_numbers = #tpu.dot_dimension_numbers<[1], [0], [0], [1], [0, 0, 1, 1], [], []>} : vector<2x16xbf16>, vector<16x256xbf16>, vector<2x256xf32> -> vector<2x256xf32>
    %c0_3 = arith.constant 0 : index
    %c0_4 = arith.constant 0 : index
    %4 = vector.load %arg3[%c0_3, %c0_4] : memref<1x256xf32, #tpu.memory_space<vmem>>, vector<1x256xf32>
    %5 = vector.broadcast %4 : vector<1x256xf32> to vector<2x256xf32>
    %6 = arith.addf %3, %5 : vector<2x256xf32>
    %cst_5 = arith.constant 0.000000e+00 : f32
    %7 = vector.broadcast %cst_5 : f32 to vector<2x256xf32>
    %8 = arith.maximumf %6, %7 : vector<2x256xf32>
    %c0_6 = arith.constant 0 : index
    %c0_7 = arith.constant 0 : index
    %9 = vector.load %arg4[%c0_6, %c0_7] : memref<1x256xf32, #tpu.memory_space<vmem>>, vector<1x256xf32>
    %c0_8 = arith.constant 0 : index
    %c0_9 = arith.constant 0 : index
    %10 = vector.load %arg5[%c0_8, %c0_9] : memref<1x256xf32, #tpu.memory_space<vmem>>, vector<1x256xf32>
    %cst_10 = arith.constant dense<0.000000e+00> : vector<2xf32>
    %11 = vector.multi_reduction <add>, %8, %cst_10 [1] : vector<2x256xf32> to vector<2xf32>
    %12 = vector.shape_cast %11 : vector<2xf32> to vector<2x1xf32>
    %cst_11 = arith.constant 2.560000e+02 : f32
    %13 = vector.broadcast %cst_11 : f32 to vector<2x1xf32>
    %14 = arith.divf %12, %13 : vector<2x1xf32>
    %15 = arith.mulf %8, %8 : vector<2x256xf32>
    %cst_12 = arith.constant dense<0.000000e+00> : vector<2xf32>
    %16 = vector.multi_reduction <add>, %15, %cst_12 [1] : vector<2x256xf32> to vector<2xf32>
    %17 = vector.shape_cast %16 : vector<2xf32> to vector<2x1xf32>
    %cst_13 = arith.constant 2.560000e+02 : f32
    %18 = vector.broadcast %cst_13 : f32 to vector<2x1xf32>
    %19 = arith.divf %17, %18 : vector<2x1xf32>
    %20 = arith.mulf %14, %14 : vector<2x1xf32>
    %21 = arith.subf %19, %20 : vector<2x1xf32>
    %22 = vector.broadcast %14 : vector<2x1xf32> to vector<2x256xf32>
    %23 = arith.subf %8, %22 : vector<2x256xf32>
    %cst_14 = arith.constant 9.99999974E-6 : f32
    %24 = vector.broadcast %cst_14 : f32 to vector<2x1xf32>
    %25 = arith.addf %21, %24 : vector<2x1xf32>
    %26 = math.rsqrt %25 : vector<2x1xf32>
    %27 = vector.broadcast %26 : vector<2x1xf32> to vector<2x256xf32>
    %28 = arith.mulf %23, %27 : vector<2x256xf32>
    %29 = vector.broadcast %9 : vector<1x256xf32> to vector<2x256xf32>
    %30 = arith.mulf %28, %29 : vector<2x256xf32>
    %31 = vector.broadcast %10 : vector<1x256xf32> to vector<2x256xf32>
    %32 = arith.addf %30, %31 : vector<2x256xf32>
    %33 = arith.truncf %32 : vector<2x256xf32> to vector<2x256xbf16>
    %c0_15 = arith.constant 0 : index
    %c0_16 = arith.constant 0 : index
    %34 = vector.load %arg6[%c0_15, %c0_16] : memref<256x256xbf16, #tpu.memory_space<vmem>>, vector<256x256xbf16>
    %cst_17 = arith.constant dense<0.000000e+00> : vector<2x256xf32>
    %35 = tpu.matmul %33, %34, %cst_17 {dimension_numbers = #tpu.dot_dimension_numbers<[1], [0], [0], [1], [0, 0, 1, 1], [], []>} : vector<2x256xbf16>, vector<256x256xbf16>, vector<2x256xf32> -> vector<2x256xf32>
    %c0_18 = arith.constant 0 : index
    %c0_19 = arith.constant 0 : index
    %36 = vector.load %arg7[%c0_18, %c0_19] : memref<1x256xf32, #tpu.memory_space<vmem>>, vector<1x256xf32>
    %37 = vector.broadcast %36 : vector<1x256xf32> to vector<2x256xf32>
    %38 = arith.addf %35, %37 : vector<2x256xf32>
    %cst_20 = arith.constant 0.000000e+00 : f32
    %39 = vector.broadcast %cst_20 : f32 to vector<2x256xf32>
    %40 = arith.maximumf %38, %39 : vector<2x256xf32>
    %c0_21 = arith.constant 0 : index
    %c0_22 = arith.constant 0 : index
    %41 = vector.load %arg8[%c0_21, %c0_22] : memref<1x256xf32, #tpu.memory_space<vmem>>, vector<1x256xf32>
    %c0_23 = arith.constant 0 : index
    %c0_24 = arith.constant 0 : index
    %42 = vector.load %arg9[%c0_23, %c0_24] : memref<1x256xf32, #tpu.memory_space<vmem>>, vector<1x256xf32>
    %cst_25 = arith.constant dense<0.000000e+00> : vector<2xf32>
    %43 = vector.multi_reduction <add>, %40, %cst_25 [1] : vector<2x256xf32> to vector<2xf32>
    %44 = vector.shape_cast %43 : vector<2xf32> to vector<2x1xf32>
    %cst_26 = arith.constant 2.560000e+02 : f32
    %45 = vector.broadcast %cst_26 : f32 to vector<2x1xf32>
    %46 = arith.divf %44, %45 : vector<2x1xf32>
    %47 = arith.mulf %40, %40 : vector<2x256xf32>
    %cst_27 = arith.constant dense<0.000000e+00> : vector<2xf32>
    %48 = vector.multi_reduction <add>, %47, %cst_27 [1] : vector<2x256xf32> to vector<2xf32>
    %49 = vector.shape_cast %48 : vector<2xf32> to vector<2x1xf32>
    %cst_28 = arith.constant 2.560000e+02 : f32
    %50 = vector.broadcast %cst_28 : f32 to vector<2x1xf32>
    %51 = arith.divf %49, %50 : vector<2x1xf32>
    %52 = arith.mulf %46, %46 : vector<2x1xf32>
    %53 = arith.subf %51, %52 : vector<2x1xf32>
    %54 = vector.broadcast %46 : vector<2x1xf32> to vector<2x256xf32>
    %55 = arith.subf %40, %54 : vector<2x256xf32>
    %cst_29 = arith.constant 9.99999974E-6 : f32
    %56 = vector.broadcast %cst_29 : f32 to vector<2x1xf32>
    %57 = arith.addf %53, %56 : vector<2x1xf32>
    %58 = math.rsqrt %57 : vector<2x1xf32>
    %59 = vector.broadcast %58 : vector<2x1xf32> to vector<2x256xf32>
    %60 = arith.mulf %55, %59 : vector<2x256xf32>
    %61 = vector.broadcast %41 : vector<1x256xf32> to vector<2x256xf32>
    %62 = arith.mulf %60, %61 : vector<2x256xf32>
    %63 = vector.broadcast %42 : vector<1x256xf32> to vector<2x256xf32>
    %64 = arith.addf %62, %63 : vector<2x256xf32>
    %65 = arith.truncf %64 : vector<2x256xf32> to vector<2x256xbf16>
    %c0_30 = arith.constant 0 : index
    %c0_31 = arith.constant 0 : index
    %66 = vector.load %arg10[%c0_30, %c0_31] : memref<256x128xbf16, #tpu.memory_space<vmem>>, vector<256x128xbf16>
    %cst_32 = arith.constant dense<0.000000e+00> : vector<2x128xf32>
    %67 = tpu.matmul %65, %66, %cst_32 {dimension_numbers = #tpu.dot_dimension_numbers<[1], [0], [0], [1], [0, 0, 1, 1], [], []>} : vector<2x256xbf16>, vector<256x128xbf16>, vector<2x128xf32> -> vector<2x128xf32>
    %c0_33 = arith.constant 0 : index
    %c0_34 = arith.constant 0 : index
    %68 = vector.load %arg11[%c0_33, %c0_34] : memref<1x128xf32, #tpu.memory_space<vmem>>, vector<1x128xf32>
    %69 = vector.broadcast %68 : vector<1x128xf32> to vector<2x128xf32>
    %70 = arith.addf %67, %69 : vector<2x128xf32>
    %cst_35 = arith.constant 0.000000e+00 : f32
    %71 = vector.broadcast %cst_35 : f32 to vector<2x128xf32>
    %72 = arith.maximumf %70, %71 : vector<2x128xf32>
    %73 = arith.truncf %72 : vector<2x128xf32> to vector<2x128xbf16>
    %c0_36 = arith.constant 0 : index
    %c0_37 = arith.constant 0 : index
    %74 = vector.load %arg12[%c0_36, %c0_37] : memref<128x4xbf16, #tpu.memory_space<vmem>>, vector<128x4xbf16>
    %cst_38 = arith.constant dense<0.000000e+00> : vector<2x4xf32>
    %75 = tpu.matmul %73, %74, %cst_38 {dimension_numbers = #tpu.dot_dimension_numbers<[1], [0], [0], [1], [0, 0, 1, 1], [], []>} : vector<2x128xbf16>, vector<128x4xbf16>, vector<2x4xf32> -> vector<2x4xf32>
    %c0_39 = arith.constant 0 : index
    %c0_40 = arith.constant 0 : index
    %76 = vector.load %arg13[%c0_39, %c0_40] : memref<1x4xf32, #tpu.memory_space<vmem>>, vector<1x4xf32>
    %77 = vector.broadcast %76 : vector<1x4xf32> to vector<2x4xf32>
    %78 = arith.addf %75, %77 : vector<2x4xf32>
    %c0_41 = arith.constant 0 : index
    %c0_42 = arith.constant 0 : index
    %79 = vector.load %arg14[%c0_41, %c0_42] : memref<2x4xf32, #tpu.memory_space<vmem>>, vector<2x4xf32>
    tpu.vector_store %arg14[%c0_41, %c0_42], %78 {strides = array<i32>} : memref<2x4xf32, #tpu.memory_space<vmem>>, vector<2x4xf32>,
    return
  }
  func.func @transform_0(%arg0: i32) -> (i32, i32) {
    %c0_i32 = arith.constant 0 : i32
    %c0_i32_0 = arith.constant 0 : i32
    return %arg0, %c0_i32 : i32, i32
  }
  func.func @transform_1(%arg0: i32) -> (i32, i32) {
    %c0_i32 = arith.constant 0 : i32
    %c0_i32_0 = arith.constant 0 : i32
    %c0_i32_1 = arith.constant 0 : i32
    return %c0_i32, %c0_i32_0 : i32, i32
  }
  func.func @transform_2(%arg0: i32) -> (i32, i32) {
    %c0_i32 = arith.constant 0 : i32
    %c0_i32_0 = arith.constant 0 : i32
    %c0_i32_1 = arith.constant 0 : i32
    return %c0_i32, %c0_i32_0 : i32, i32
  }
  func.func @transform_3(%arg0: i32) -> (i32, i32) {
    %c0_i32 = arith.constant 0 : i32
    %c0_i32_0 = arith.constant 0 : i32
    %c0_i32_1 = arith.constant 0 : i32
    return %c0_i32, %c0_i32_0 : i32, i32
  }
  func.func @transform_4(%arg0: i32) -> (i32, i32) {
    %c0_i32 = arith.constant 0 : i32
    %c0_i32_0 = arith.constant 0 : i32
    %c0_i32_1 = arith.constant 0 : i32
    return %c0_i32, %c0_i32_0 : i32, i32
  }
  func.func @transform_5(%arg0: i32) -> (i32, i32) {
    %c0_i32 = arith.constant 0 : i32
    %c0_i32_0 = arith.constant 0 : i32
    %c0_i32_1 = arith.constant 0 : i32
    return %c0_i32, %c0_i32_0 : i32, i32
  }
  func.func @transform_6(%arg0: i32) -> (i32, i32) {
    %c0_i32 = arith.constant 0 : i32
    %c0_i32_0 = arith.constant 0 : i32
    %c0_i32_1 = arith.constant 0 : i32
    return %c0_i32, %c0_i32_0 : i32, i32
  }
  func.func @transform_7(%arg0: i32) -> (i32, i32) {
    %c0_i32 = arith.constant 0 : i32
    %c0_i32_0 = arith.constant 0 : i32
    %c0_i32_1 = arith.constant 0 : i32
    return %c0_i32, %c0_i32_0 : i32, i32
  }
  func.func @transform_8(%arg0: i32) -> (i32, i32) {
    %c0_i32 = arith.constant 0 : i32
    %c0_i32_0 = arith.constant 0 : i32
    %c0_i32_1 = arith.constant 0 : i32
    return %c0_i32, %c0_i32_0 : i32, i32
  }
  func.func @transform_9(%arg0: i32) -> (i32, i32) {
    %c0_i32 = arith.constant 0 : i32
    %c0_i32_0 = arith.constant 0 : i32
    %c0_i32_1 = arith.constant 0 : i32
    return %c0_i32, %c0_i32_0 : i32, i32
  }
  func.func @transform_10(%arg0: i32) -> (i32, i32) {
    %c0_i32 = arith.constant 0 : i32
    %c0_i32_0 = arith.constant 0 : i32
    %c0_i32_1 = arith.constant 0 : i32
    return %c0_i32, %c0_i32_0 : i32, i32
  }
  func.func @transform_11(%arg0: i32) -> (i32, i32) {
    %c0_i32 = arith.constant 0 : i32
    %c0_i32_0 = arith.constant 0 : i32
    %c0_i32_1 = arith.constant 0 : i32
    return %c0_i32, %c0_i32_0 : i32, i32
  }
  func.func @transform_12(%arg0: i32) -> (i32, i32) {
    %c0_i32 = arith.constant 0 : i32
    %c0_i32_0 = arith.constant 0 : i32
    %c0_i32_1 = arith.constant 0 : i32
    return %c0_i32, %c0_i32_0 : i32, i32
  }
  func.func @transform_13(%arg0: i32) -> (i32, i32) {
    %c0_i32 = arith.constant 0 : i32
    %c0_i32_0 = arith.constant 0 : i32
    return %arg0, %c0_i32 : i32, i32
  }
}

</mosaic_0001>

<bundles_post_ra>
// kernel: dqn_forward.1
= control target key start
LH: loop header
LB: loop body
LE: loop exit
PB: predicated region body
PF: predicated region fallthrough
CT: control target
= control target key end

     0   :  { %18 = vsyncpa [#allocation3], 0  ;;  %s1255_s0 = inlined_call_operand.vmem [shape: f32[2,16], index: 0, kind: input, shape index: {}]   ;;  %s1256_s1 = inlined_call_operand.vmem [shape: bf16[16,256], index: 1, kind: input, shape index: {}]   ;;  %s1257_s2 = inlined_call_operand.vmem [shape: f32[1,256], index: 2, kind: input, shape index: {}]   ;;  %s1258_s3 = inlined_call_operand.vmem [shape: f32[1,256], index: 3, kind: input, shape index: {}]   ;;  %s1259_s4 = inlined_call_operand.vmem [shape: f32[1,256], index: 4, kind: input, shape index: {}]   ;;  %s1260_s5 = inlined_call_operand.hbm [shape: bf16[256,256], index: 5, kind: input, shape index: {}]   ;;  %s1261_s6 = inlined_call_operand.vmem [shape: f32[1,256], index: 6, kind: input, shape index: {}]   ;;  %s1262_s7 = inlined_call_operand.vmem [shape: f32[1,256], index: 7, kind: input, shape index: {}]   ;;  %s1263_s8 = inlined_call_operand.vmem [shape: f32[1,256], index: 8, kind: input, shape index: {}]   ;;  %s1264_s9 = inlined_call_operand.hbm [shape: bf16[256,128], index: 9, kind: input, shape index: {}]   ;;  %s1265_s10 = inlined_call_operand.vmem [shape: f32[1,128], index: 10, kind: input, shape index: {}]   ;;  %s1266_s11 = inlined_call_operand.vmem [shape: bf16[128,4], index: 11, kind: input, shape index: {}]   ;;  %s1267_s12 = inlined_call_operand.vmem [shape: f32[1,4], index: 12, kind: input, shape index: {}]   ;;  %s1268_s13 = inlined_call_operand.hbm [shape: f32[2,4], index: 13, kind: output, shape index: {}]  }
   0x1   :  { %19 = vsyncpa [#allocation6], 0 }
   0x2   :  { %20 = vsyncpa [#allocation4], 0  ;;  %s1073_s25 = smov [#allocation2]  }
   0x3   :  { %s36_s26 = sshll.u32 %s1073_s25, 4  ;;  %s37_s26 = int_to_ptr.vmem [resolvable:$true] %s36_s26 }
   0x4   :  { %s1015_s27 = scalar_lea.vmem %s37_s26, 4096  ;;  %p1020_p1 = scmp.lt.s32.totalorder %s37_s26, %s37_s26 }
   0x5   :  { %p1016_p0 = scmp.ne.s32.totalorder %s37_s26, %s1015_s27  ;;  %p1021_p2 = scmp.lt.s32.totalorder %s1015_s27, %s1015_s27 }
   0x7   :  { %p1022_p3 = por %p1021_p2, %p1020_p1 }
   0x9   :  { %p1023_p4 = pnand %p1022_p3, %p1016_p0 }
   0xb   :  { %1026 = shalt.err (!%p1023_p4)
}
   0xc   :  { %s1074_s28 = smov 128   ;;  %s1075_s29 = smov 8  }
   0xd   :  { %42 = dma.hbm_to_vmem [thread:$0]  %s1260_s5, 4096, %s37_s26, [#allocation3], %s1074_s28, %s1074_s28, %s1075_s29  }
   0xe   :  { %s1076_s15 = smov [#allocation5]  }
   0xf   :  { %s54_s16 = sshll.u32 %s1076_s15, 4  ;;  %s55_s16 = int_to_ptr.vmem [resolvable:$true] %s54_s16 }
  0x10   :  { %s1035_s17 = scalar_lea.vmem %s55_s16, 2048  ;;  %p1040_p6 = scmp.lt.s32.totalorder %s55_s16, %s55_s16 }
  0x11   :  { %p1036_p5 = scmp.ne.s32.totalorder %s55_s16, %s1035_s17  ;;  %p1041_p7 = scmp.lt.s32.totalorder %s1035_s17, %s1035_s17 }
  0x13   :  { %p1042_p8 = por %p1041_p7, %p1040_p6 }
  0x15   :  { %p1043_p9 = pnand %p1042_p8, %p1036_p5 }
  0x17   :  { %1046 = shalt.err (!%p1043_p9)
}
  0x18   :  { %s1077_s18 = smov 64   ;;  %s1078_s19 = smov 4  }
  0x19   :  { %60 = dma.hbm_to_vmem [thread:$0]  %s1264_s9, 2048, %s55_s16, [#allocation6], %s1077_s18, %s1077_s18, %s1078_s19  }
  0x1a   :  { %1067 = dma.done.wait [#allocation3], 4096  }
  0x1b   :  { %1068 = vsyncadd [#allocation3], 4294963200 }
  0x1c   :  { %1069 = dma.done.wait [#allocation6], 2048  }
  0x1d   :  { %1070 = vsyncadd [#allocation6], 4294965248  ;;  %v1079_v0 = vmov 0   ;;  %v928_v1 = vld [vmem:[%s1256_s1 + $0x4] ss:$8 sps:$4 sm:$0xff]   ;;  %vm100_vm0 = vcmask 130048   ;;  %v80_v21 = vlaneseq }
  0x1e   :  { %136 = vmatprep.mubr.bf16.mxu0 %v1079_v0  ;;  %v930_v2 = vld [vmem:[%s1256_s1] ss:$8 sps:$4 sm:$0xff]   ;;  %118 = vmatprep.subr.bf16.mxu0 %v928_v1  ;;  %v931_v5 = vld [vmem:[#allocation2 + $0x74] ss:$8 sps:$4 sm:$0xff]   ;;  %v933_v6 = vld [vmem:[#allocation2 + $0x70] ss:$8 sps:$4 sm:$0xff]  }
  0x1f   :  { %v74_v3 = vld [vmem:[%s1255_s0] sm:$0x3]  ;;  %119 = vmatpush1.bf16.msra.mxu0 %v930_v2  ;;  %v934_v7 = vld [vmem:[#allocation2 + $0x64] ss:$8 sps:$4 sm:$0xff]   ;;  %405 = vmatprep.subr.bf16.mxu1 %v931_v5  ;;  %v937_v9 = vld [vmem:[#allocation2 + $0x54] ss:$8 sps:$4 sm:$0xff]  }
  0x20   :  { %v75_v4 = vpack.c.bf16 %v74_v3, %v74_v3  ;;  %406 = vmatpush1.bf16.msra.mxu1 %v933_v6  ;;  %v936_v8 = vld [vmem:[#allocation2 + $0x60] ss:$8 sps:$4 sm:$0xff]   ;;  %v939_v10 = vld [vmem:[#allocation2 + $0x50] ss:$8 sps:$4 sm:$0xff]   ;;  %v940_v11 = vld [vmem:[#allocation2 + $0x44] ss:$8 sps:$4 sm:$0xff]  }
  0x21   :  { %407 = vmatprep.subr.bf16.mxu1 %v934_v7  ;;  %v942_v12 = vld [vmem:[#allocation2 + $0x40] ss:$8 sps:$4 sm:$0xff]   ;;  %v943_v13 = vld [vmem:[#allocation2 + $0x34] ss:$8 sps:$4 sm:$0xff]   ;;  %v945_v14 = vld [vmem:[#allocation2 + $0x30] ss:$8 sps:$4 sm:$0xff]  }
  0x22   :  { %808 = vmatmul.mubr.msk.bf16.vlgmr.msra.gmra.mxu0 %vm100_vm0, %v75_v4  ;;  %v946_v15 = vld [vmem:[#allocation2 + $0x24] ss:$8 sps:$4 sm:$0xff]   ;;  %v948_v16 = vld [vmem:[#allocation2 + $0x20] ss:$8 sps:$4 sm:$0xff]   ;;  %v949_v17 = vld [vmem:[#allocation2 + $0x14] ss:$8 sps:$4 sm:$0xff]  }
  0x23   :  { %v951_v18 = vld [vmem:[#allocation2 + $0x10] ss:$8 sps:$4 sm:$0xff]   ;;  %v952_v19 = vld [vmem:[#allocation2 + $0x4] ss:$8 sps:$4 sm:$0xff]   ;;  %v954_v20 = vld [vmem:[#allocation2] ss:$8 sps:$4 sm:$0xff]  }
  0x24   :  { %408 = vmatpush1.bf16.msra.mxu1 %v936_v8  ;;  %v81_v22 = vshrl.u32 %v80_v21, 7  ;;  %v78_v24 = vld [vmem:[%s1257_s2] sm:$0x3]  ;;  %vm149_vm1 = vcmask 1041408   ;;  %v955_v44 = vld [vmem:[#allocation2 + $0xf4] ss:$8 sps:$4 sm:$0xff]  }
  0x25   :  { %409 = vmatprep.subr.bf16.mxu1 %v937_v9  ;;  %v957_v45 = vld [vmem:[#allocation2 + $0xf0] ss:$8 sps:$4 sm:$0xff]   ;;  %v958_v46 = vld [vmem:[#allocation2 + $0xe4] ss:$8 sps:$4 sm:$0xff]   ;;  %v960_v47 = vld [vmem:[#allocation2 + $0xe0] ss:$8 sps:$4 sm:$0xff]  }
  0x26   :  { %v1168_v23 = vsub.s32 0, %v81_v22  ;;  %v1173_v25 = vsub.s32 1, %v81_v22  ;;  %v961_v48 = vld [vmem:[#allocation2 + $0xd4] ss:$8 sps:$4 sm:$0xff]   ;;  %v963_v49 = vld [vmem:[#allocation2 + $0xd0] ss:$8 sps:$4 sm:$0xff]  }
  0x27   :  { %v964_v50 = vld [vmem:[#allocation2 + $0xc4] ss:$8 sps:$4 sm:$0xff]   ;;  %v966_v51 = vld [vmem:[#allocation2 + $0xc0] ss:$8 sps:$4 sm:$0xff]   ;;  %v967_v52 = vld [vmem:[#allocation2 + $0xb4] ss:$8 sps:$4 sm:$0xff]  }
  0x28   :  { %410 = vmatpush1.bf16.msra.mxu1 %v939_v10  ;;  %v83_v26 = vrot.slane %v78_v24, %v1168_v23  ;;  %v87_v27 = vrot.slane %v78_v24, %v1173_v25  ;;  %v969_v53 = vld [vmem:[#allocation2 + $0xb0] ss:$8 sps:$4 sm:$0xff]   ;;  %v970_v54 = vld [vmem:[#allocation2 + $0xa4] ss:$8 sps:$4 sm:$0xff]   ;;  %v972_v55 = vld [vmem:[#allocation2 + $0xa0] ss:$8 sps:$4 sm:$0xff]  }
  0x29   :  { %411 = vmatprep.subr.bf16.mxu1 %v940_v11  ;;  %v973_v56 = vld [vmem:[#allocation2 + $0x94] ss:$8 sps:$4 sm:$0xff]   ;;  %v975_v57 = vld [vmem:[#allocation2 + $0x90] ss:$8 sps:$4 sm:$0xff]   ;;  %v976_v58 = vld [vmem:[#allocation2 + $0x84] ss:$8 sps:$4 sm:$0xff]  }
  0x2a   :  { %v978_v59 = vld [vmem:[#allocation2 + $0x80] ss:$8 sps:$4 sm:$0xff]   ;;  %vm1081_vm2 = vmmov 0   ;;  %vm788_vm3 = vcmask 25600  }
  0x2b   :  { %v147_v3 = vld [vmem:[%s1258_s3] sm:$0x3] }
  0x2c   :  { %412 = vmatpush1.bf16.msra.mxu1 %v942_v12  ;;  %v148_v4 = vld [vmem:[%s1259_s4] sm:$0x3]  ;;  %v177_v7 = vrot.slane %v147_v3, %v1168_v23  ;;  %v181_v8 = vrot.slane %v147_v3, %v1173_v25 }
  0x2d   :  { %413 = vmatprep.subr.bf16.mxu1 %v943_v13  ;;  %v190_v11 = vrot.slane %v148_v4, %v1168_v23  ;;  %v194_v12 = vrot.slane %v148_v4, %v1173_v25 }
  0x30   :  { %414 = vmatpush1.bf16.msra.mxu1 %v945_v14 }
  0x31   :  { %415 = vmatprep.subr.bf16.mxu1 %v946_v15 }
  0x34   :  { %416 = vmatpush1.bf16.msra.mxu1 %v948_v16 }
  0x35   :  { %417 = vmatprep.subr.bf16.mxu1 %v949_v17 }
  0x38   :  { %418 = vmatpush1.bf16.msra.mxu1 %v951_v18 }
  0x39   :  { %419 = vmatprep.subr.bf16.mxu1 %v952_v19 }
  0x3c   :  { %420 = vmatpush1.bf16.msra.mxu1 %v954_v20  ;;  %v233_v20 = vld [vmem:[%s1261_s6] sm:$0x3] }
  0x3d   :  { %421 = vmatprep.subr.bf16.mxu1 %v955_v44  ;;  %v238_v21 = vrot.slane %v233_v20, %v1168_v23  ;;  %v242_v22 = vrot.slane %v233_v20, %v1173_v25  ;;  %v982_v44 = vld [vmem:[#allocation5 + $0x30] sm:$0xff]   ;;  %v999_v20 = vld [vmem:[%s1266_s11 + $0x18] sm:$0xff]  }
  0x40   :  { %422 = vmatpush2.bf16.msra.mxu1 %v957_v45  ;;  %v983_v45 = vld [vmem:[#allocation5 + $0x68] sm:$0xff]  }
  0x41   :  { %423 = vmatprep.subr.bf16.mxu1 %v958_v46  ;;  %v984_v46 = vld [vmem:[#allocation5 + $0x28] sm:$0xff]  }
  0x44   :  { %424 = vmatpush2.bf16.msra.mxu1 %v960_v47  ;;  %v985_v47 = vld [vmem:[#allocation5 + $0x60] sm:$0xff]  }
  0x45   :  { %425 = vmatprep.subr.bf16.mxu1 %v961_v48  ;;  %v986_v48 = vld [vmem:[#allocation5 + $0x20] sm:$0xff]  }
  0x48   :  { %426 = vmatpush2.bf16.msra.mxu1 %v963_v49  ;;  %v987_v49 = vld [vmem:[#allocation5 + $0x58] sm:$0xff]  }
  0x49   :  { %427 = vmatprep.subr.bf16.mxu1 %v964_v50  ;;  %v988_v50 = vld [vmem:[#allocation5 + $0x18] sm:$0xff]  }
  0x4c   :  { %428 = vmatpush2.bf16.msra.mxu1 %v966_v51  ;;  %v989_v51 = vld [vmem:[#allocation5 + $0x50] sm:$0xff]  }
  0x4d   :  { %429 = vmatprep.subr.bf16.mxu1 %v967_v52  ;;  %v990_v52 = vld [vmem:[#allocation5 + $0x10] sm:$0xff]  }
  0x50   :  { %430 = vmatpush2.bf16.msra.mxu1 %v969_v53  ;;  %v991_v53 = vld [vmem:[#allocation5 + $0x48] sm:$0xff]  }
  0x51   :  { %431 = vmatprep.subr.bf16.mxu1 %v970_v54  ;;  %v992_v54 = vld [vmem:[#allocation5 + $0x8] sm:$0xff]  }
  0x54   :  { %432 = vmatpush2.bf16.msra.mxu1 %v972_v55  ;;  %v993_v55 = vld [vmem:[#allocation5 + $0x40] sm:$0xff]  }
  0x55   :  { %433 = vmatprep.subr.bf16.mxu1 %v973_v56  ;;  %v994_v56 = vld [vmem:[#allocation5] sm:$0xff]  }
  0x58   :  { %434 = vmatpush2.bf16.msra.mxu1 %v975_v57  ;;  %v1080_v57 = vmov 0.0  }
  0x59   :  { %435 = vmatprep.subr.bf16.mxu1 %v976_v58 }
  0x5c   :  { %436 = vmatpush2.bf16.msra.mxu1 %v978_v59 }
  0xe2   :  { %v138_v28 = vpop.f32.mrf.mxu0 }
  0xe3   :  { %v139_v29 = vadd.f32 %v138_v28, %v83_v26 }
  0xe4   :  { %v140_v30 = vpop.f32.mrf.mxu0 }
  0xe5   :  { %v1177_v31 = vmax.f32 %v139_v29, 0.0  ;;  %v141_v32 = vadd.f32 %v140_v30, %v87_v27 }
  0xe6   :  { %v142_v33 = vpop.f32.mrf.mxu0 }
  0xe7   :  { %v146_v34 = vmax.f32 %v141_v32, 0.0  ;;  %v150_v36 = vsel %vm149_vm1, %v1177_v31, 0.0  ;;  %v157_v38 = vmul.f32 %v1177_v31, %v1177_v31 }
  0xe8   :  { %v143_v35 = vpop.f32.mrf.mxu0 }
  0xe9   :  { %v151_v37 = vsel %vm149_vm1, %v146_v34, 0.0  ;;  %v158_v39 = vmul.f32 %v146_v34, %v146_v34  ;;  %v159_v42 = vsel %vm149_vm1, %v157_v38, 0.0 }
  0xea   :  { %v152_v40 = vadd.f32 %v151_v37, %v150_v36 }
  0xeb   :  { %v160_v41 = vsel %vm149_vm1, %v158_v39, 0.0 }
  0xec   :  { %153 = vadd.xlane.f32.xlu0 %v152_v40  ;;  %v161_v43 = vadd.f32 %v160_v41, %v159_v42  ;;  %v979_v41 = vld [vmem:[#allocation5 + $0x78] sm:$0xff]  }
  0xed   :  { %v980_v42 = vld [vmem:[#allocation5 + $0x38] sm:$0xff]   ;;  %867 = vmatprep.subr.bf16.mxu0 %v979_v41 }
  0xee   :  { %868 = vmatpush3.bf16.msra.mxu0 %v980_v42 }
  0xf0   :  { %162 = vadd.xlane.f32.xlu0 %v161_v43  ;;  %v981_v43 = vld [vmem:[#allocation5 + $0x70] sm:$0xff]  }
  0xf1   :  { %869 = vmatprep.subr.bf16.mxu0 %v981_v43 }
  0xf2   :  { %870 = vmatpush3.bf16.msra.mxu0 %v982_v44 }
  0xf3   :  { %871 = vmatprep.subr.bf16.mxu0 %v983_v45 }
  0xf6   :  { %872 = vmatpush3.bf16.msra.mxu0 %v984_v46 }
  0xf7   :  { %873 = vmatprep.subr.bf16.mxu0 %v985_v47 }
  0xfa   :  { %874 = vmatpush3.bf16.msra.mxu0 %v986_v48 }
  0xfb   :  { %875 = vmatprep.subr.bf16.mxu0 %v987_v49 }
  0xfe   :  { %876 = vmatpush3.bf16.msra.mxu0 %v988_v50 }
  0xff   :  { %877 = vmatprep.subr.bf16.mxu0 %v989_v51 }
 0x102   :  { %878 = vmatpush3.bf16.msra.mxu0 %v990_v52 }
 0x103   :  { %879 = vmatprep.subr.bf16.mxu0 %v991_v53 }
 0x106   :  { %880 = vmatpush3.bf16.msra.mxu0 %v992_v54 }
 0x107   :  { %881 = vmatprep.subr.bf16.mxu0 %v993_v55 }
 0x10a   :  { %882 = vmatpush3.bf16.msra.mxu0 %v994_v56 }
 0x10b   :  { %898 = vmatprep.subr.bf16.mxu0 %v1080_v57 }
 0x175   :  { %v154_v60 = vpop.xlane.xlu0 %153 }
 0x176   :  { %v156_v61 = vmul.f32 0.00390625, %v154_v60 }
 0x178   :  { %v165_v63 = vmul.f32 %v156_v61, %v156_v61  ;;  %v167_v5 = vsub.f32 %v1177_v31, %v156_v61  ;;  %v168_v6 = vsub.f32 %v146_v34, %v156_v61 }
 0x179   :  { %v163_v62 = vpop.xlane.xlu0 %162 }
 0x17a   :  { %v164_v0 = vmul.f32 0.00390625, %v163_v62 }
 0x17c   :  { %v166_v1 = vsub.f32 %v164_v0, %v165_v63 }
 0x17e   :  { %v169_v2 = vadd.f32 1e-05, %v166_v1  ;;  %v448_v1 = vld [vmem:[%s1262_s7] sm:$0x3] }
 0x180   :  { %1003 = vrsqrt.f32 %v169_v2  ;;  %v449_v2 = vld [vmem:[%s1263_s8] sm:$0x3] }
 0x18d   :  { %v1004_v9 = vpop.eup %1003 }
 0x18e   :  { %v172_v10 = vmul.f32 %v1004_v9, %v168_v6  ;;  %v171_v13 = vmul.f32 %v1004_v9, %v167_v5  ;;  %v476_v5 = vrot.slane %v448_v1, %v1168_v23  ;;  %v480_v6 = vrot.slane %v448_v1, %v1173_v25 }
 0x18f   :  { %v489_v9 = vrot.slane %v449_v2, %v1168_v23  ;;  %v996_v23 = vld [vmem:[%s1266_s11 + $0x30] sm:$0xff]  }
 0x190   :  { %v185_v14 = vmul.f32 %v181_v8, %v172_v10  ;;  %v184_v15 = vmul.f32 %v177_v7, %v171_v13  ;;  %v493_v10 = vrot.slane %v449_v2, %v1173_v25  ;;  %v997_v25 = vld [vmem:[%s1266_s11 + $0x28] sm:$0xff]  }
 0x192   :  { %v198_v16 = vadd.f32 %v194_v12, %v185_v14  ;;  %v197_v17 = vadd.f32 %v190_v11, %v184_v15 }
 0x194   :  { %v200_v18 = vpack.c.bf16 %v198_v16, %v198_v16  ;;  %v199_v19 = vpack.c.bf16 %v197_v17, %v197_v17 }
 0x196   :  { %437 = vmatprep.mubr.bf16.mxu1 %v200_v18  ;;  %v995_v18 = vld [vmem:[%s1266_s11 + $0x38] sm:$0xff]  }
 0x197   :  { %438 = vmatmul.mubr.bf16.vlgmr.msra.gmra.mxu1 %v199_v19  ;;  %v998_v19 = vld [vmem:[%s1266_s11 + $0x20] sm:$0xff]  }
 0x257   :  { %v439_v24 = vpop.f32.mrf.mxu1 }
 0x258   :  { %v440_v26 = vadd.f32 %v439_v24, %v238_v21  ;;  %v1000_v21 = vld [vmem:[%s1266_s11 + $0x10] sm:$0xff]   ;;  %v1002_v24 = vld [vmem:[%s1266_s11] sm:$0xff]  }
 0x259   :  { %v441_v27 = vpop.f32.mrf.mxu1 }
 0x25a   :  { %v1202_v28 = vmax.f32 %v440_v26, 0.0  ;;  %v442_v29 = vadd.f32 %v441_v27, %v242_v22  ;;  %v1001_v22 = vld [vmem:[%s1266_s11 + $0x8] sm:$0xff]   ;;  %v841_v27 = vld [vmem:[%s1265_s10] ss:$0 sm:$0xff]  ;;  %s1082_s11 = smov [#allocation7]  }
 0x25b   :  { %v443_v30 = vpop.f32.mrf.mxu1  ;;  %s796_s28 = sshll.u32 %s1082_s11, 4  ;;  %s797_s28 = int_to_ptr.vmem [resolvable:$true] %s796_s28 }
 0x25c   :  { %v447_v31 = vmax.f32 %v442_v29, 0.0  ;;  %v450_v33 = vsel %vm149_vm1, %v1202_v28, 0.0  ;;  %v456_v35 = vmul.f32 %v1202_v28, %v1202_v28  ;;  %s1047_s10 = scalar_lea.vmem %s797_s28, 32  ;;  %p1052_p11 = scmp.lt.s32.totalorder %s797_s28, %s797_s28 }
 0x25d   :  { %v444_v32 = vpop.f32.mrf.mxu1  ;;  %p1048_p10 = scmp.ne.s32.totalorder %s797_s28, %s1047_s10  ;;  %p1053_p12 = scmp.lt.s32.totalorder %s1047_s10, %s1047_s10 }
 0x25e   :  { %v451_v34 = vsel %vm149_vm1, %v447_v31, 0.0  ;;  %v457_v36 = vmul.f32 %v447_v31, %v447_v31  ;;  %v458_v39 = vsel %vm149_vm1, %v456_v35, 0.0  ;;  %v858_v35 = vld [vmem:[%s1267_s12] ss:$0 sm:$0xff] }
 0x25f   :  { %v452_v37 = vadd.f32 %v451_v34, %v450_v33  ;;  %p1054_p13 = por %p1053_p12, %p1052_p11 }
 0x260   :  { %v459_v38 = vsel %vm149_vm1, %v457_v36, 0.0 }
 0x261   :  { %453 = vadd.xlane.f32.xlu1 %v452_v37  ;;  %v460_v40 = vadd.f32 %v459_v38, %v458_v39  ;;  %p1055_p0 = pnand %p1054_p13, %p1048_p10 }
 0x265   :  { %461 = vadd.xlane.f32.xlu1 %v460_v40 }
 0x2ea   :  { %v454_v58 = vpop.xlane.xlu1 %453 }
 0x2eb   :  { %v455_v59 = vmul.f32 0.00390625, %v454_v58 }
 0x2ed   :  { %v464_v61 = vmul.f32 %v455_v59, %v455_v59  ;;  %v466_v3 = vsub.f32 %v1202_v28, %v455_v59  ;;  %v467_v4 = vsub.f32 %v447_v31, %v455_v59 }
 0x2ee   :  { %v462_v60 = vpop.xlane.xlu1 %461 }
 0x2ef   :  { %v463_v62 = vmul.f32 0.00390625, %v462_v60 }
 0x2f1   :  { %v465_v63 = vsub.f32 %v463_v62, %v464_v61 }
 0x2f3   :  { %v468_v0 = vadd.f32 1e-05, %v465_v63 }
 0x2f5   :  { %1005 = vrsqrt.f32 %v468_v0 }
 0x302   :  { %v1006_v7 = vpop.eup %1005 }
 0x303   :  { %v471_v8 = vmul.f32 %v1006_v7, %v467_v4  ;;  %v470_v11 = vmul.f32 %v1006_v7, %v466_v3 }
 0x305   :  { %v484_v12 = vmul.f32 %v480_v6, %v471_v8  ;;  %v483_v13 = vmul.f32 %v476_v5, %v470_v11 }
 0x307   :  { %v497_v14 = vadd.f32 %v493_v10, %v484_v12  ;;  %v496_v15 = vadd.f32 %v489_v9, %v483_v13 }
 0x309   :  { %v499_v16 = vpack.c.bf16 %v497_v14, %v497_v14  ;;  %v498_v17 = vpack.c.bf16 %v496_v15, %v496_v15 }
 0x30b   :  { %667 = vmatprep.mubr.bf16.mxu0 %v499_v16 }
 0x30c   :  { %668 = vmatmul.mubr.bf16.vlgmr.msra.gmra.mxu0 %v498_v17 }
 0x30d   :  { %899 = vmatpush3.bf16.msra.mxu0 %v995_v18  ;;  %914 = vmatprep.mubr.msk.bf16.mxu0 %vm1081_vm2, %v1080_v57 }
 0x30e   :  { %900 = vmatprep.subr.bf16.mxu0 %v1080_v57 }
 0x311   :  { %901 = vmatpush3.bf16.msra.mxu0 %v996_v23 }
 0x312   :  { %902 = vmatprep.subr.bf16.mxu0 %v1080_v57 }
 0x315   :  { %903 = vmatpush3.bf16.msra.mxu0 %v997_v25 }
 0x316   :  { %904 = vmatprep.subr.bf16.mxu0 %v1080_v57 }
 0x319   :  { %905 = vmatpush3.bf16.msra.mxu0 %v998_v19 }
 0x31a   :  { %906 = vmatprep.subr.bf16.mxu0 %v1080_v57 }
 0x31d   :  { %907 = vmatpush3.bf16.msra.mxu0 %v999_v20 }
 0x31e   :  { %908 = vmatprep.subr.bf16.mxu0 %v1080_v57 }
 0x321   :  { %909 = vmatpush3.bf16.msra.mxu0 %v1000_v21 }
 0x322   :  { %910 = vmatprep.subr.bf16.mxu0 %v1080_v57 }
 0x325   :  { %911 = vmatpush3.bf16.msra.mxu0 %v1001_v22 }
 0x326   :  { %912 = vmatprep.subr.bf16.mxu0 %v1080_v57 }
 0x329   :  { %913 = vmatpush3.bf16.msra.mxu0 %v1002_v24 }
 0x3cc   :  { %v883_v26 = vpop.f32.mrf.mxu0 }
 0x3ce   :  { %v884_v28 = vpop.f32.mrf.mxu0 }
 0x3cf   :  { %v885_v29 = vadd.f32 %v884_v28, %v883_v26 }
 0x3d0   :  { %v886_v30 = vpop.f32.mrf.mxu0 }
 0x3d1   :  { %v670_v31 = vadd.f32 %v885_v29, %v841_v27 }
 0x3d2   :  { %v887_v32 = vpop.f32.mrf.mxu0 }
 0x3d3   :  { %v675_v33 = vmax.f32 %v670_v31, 0.0 }
 0x3d5   :  { %v676_v34 = vpack.c.bf16 %v675_v33, %v675_v33 }
 0x3d7   :  { %915 = vmatmul.mubr.bf16.vlgmr.msra.gmra.mxu0 %v676_v34 }
 0x497   :  { %v782_v36 = vpop.f32.mrf.mxu0 }
 0x498   :  { %v783_v37 = vadd.f32 %v858_v35, %v782_v36 }
 0x499   :  { %v916_v38 = vpop.f32.mrf.mxu0 }
 0x49a   :  { %789 = vst.msk [vmem:[#allocation7] sm:$0x3] %vm788_vm3, %v783_v37 }
 0x49b   :  { %v785_v39 = vpop.f32.mrf.mxu0 }
 0x49c   :  { %1058 = shalt.err (!%p1055_p0)
}
 0x49d   :  { %799 = dma.vmem_to_hbm [thread:$0]  %s797_s28, 32, %s1268_s13, [#allocation4]   ;;  %v917_v40 = vpop.f32.mrf.mxu0 }
 0x49e   :  { %1071 = dma.done.wait [#allocation4], 32  }
 0x49f   :  { %1072 = vsyncadd [#allocation4], 4294967264 }
 0x4a0   :  { %803 = vsyncpa [#allocation3], 1 }
 0x4a1   :  { %804 = vsyncpa [#allocation6], 1 }
 0x4a2   :  { %805 = vsyncpa [#allocation4], 1 }

</bundles_post_ra>
